<compile_context>
chip_gen: v7x
topology: tpu7x:2x2x1
jax: 0.10.0
libtpu: 0.0.40
codegen_flags: <defaults>
</compile_context>

<pallas_src>
import jax
import jax.numpy as jnp
from jax.experimental import pallas as pl
from jax.experimental.pallas import tpu as pltpu


def _round_up(v, m):
    return (v + m - 1) // m * m


def _cdiv(a, b):
    return -(-a // b)


def _vmem_budget_bytes():
    """Generation-aware scoped-VMEM budget (~75% of physical per-core VMEM)."""
    cap = 64 * 2 ** 20                      # conservative fallback (v7x per-core VMEM)
    try:
        info = pltpu.get_tpu_info()
        cap = int(getattr(info, "vmem_capacity_bytes", cap)) or cap
    except Exception:
        pass
    return max(32 * 2 ** 20, (cap * 3) // 4)


# --------------------------- pass 1: flow MLP over messages ---------------------------
def _flow_edge_kernel(packed_ref, w1_ref, b1_ref, w2_ref, b2_ref, fp_ref):
    """Flow MLP on one edge tile, both message directions fused.

    packed_ref : (TE, Kp)    bf16  [x_future | x_past | edge_attr | 0-pad]
    w1_ref     : (Kp, 2*Hp)  bf16  [W1_fwd | W1_bwd]
    fp_ref     : (2*TE, Hp)  bf16  rows [:TE] forward messages, rows [TE:] backward
    """
    te = packed_ref.shape[0]
    hp = w2_ref.shape[0]
    h_both = jnp.maximum(
        jnp.dot(packed_ref[...], w1_ref[...], preferred_element_type=jnp.float32)
        + b1_ref[...], 0.0)                                    # (TE, 2*Hp) f32
    w2 = w2_ref[...]
    b2 = b2_ref[...]
    fp_fwd = jnp.maximum(
        jnp.dot(h_both[:, :hp].astype(jnp.bfloat16), w2,
                preferred_element_type=jnp.float32) + b2, 0.0)
    fp_bwd = jnp.maximum(
        jnp.dot(h_both[:, hp:].astype(jnp.bfloat16), w2,
                preferred_element_type=jnp.float32) + b2, 0.0)
    fp_ref[:te, :] = fp_fwd.astype(fp_ref.dtype)
    fp_ref[te:, :] = fp_bwd.astype(fp_ref.dtype)


# ----------------------- pass 2: scatter (sum/mean) + node MLP ------------------------
def _scatter_node_kernel(idx_ref, fp_ref, cnt_ref, w3_ref, b3_ref, w4_ref, b4_ref,
                         out_ref, acc_ref):
    k = pl.program_id(1)

    @pl.when(k == 0)
    def _init():
        acc_ref[...] = jnp.zeros_like(acc_ref)

    tn = acc_ref.shape[0]
    tm = fp_ref.shape[0]                       # = 2 * edge_tile messages
    node_ids = pl.program_id(0) * tn + jax.lax.broadcasted_iota(jnp.int32, (tn, tm), 0)
    # Padded messages carry destination -1 and never match a node row (exact 0/1 in bf16).
    onehot = (node_ids == idx_ref[...]).astype(jnp.bfloat16)           # (TN, 2*TE)
    acc_ref[...] += jnp.dot(onehot, fp_ref[...], preferred_element_type=jnp.float32)

    @pl.when(k == pl.num_programs(1) - 1)
    def _finalize():
        agg = acc_ref[...] / cnt_ref[...]      # cnt == 1 for "sum"; exact divide for "mean"
        h2 = jnp.maximum(
            jnp.dot(agg.astype(jnp.bfloat16), w3_ref[...],
                    preferred_element_type=jnp.float32) + b3_ref[...], 0.0)
        out = jnp.dot(h2.astype(jnp.bfloat16), w4_ref[...],
                      preferred_element_type=jnp.float32) + b4_ref[...]
        out_ref[...] = out.astype(out_ref.dtype)


# ----------------------------------- host wrapper -------------------------------------
def uniform_agg_node_forward(x, edge_index, edge_attr, params, node_agg_mode="sum",
                             edge_tile=None, node_tile=None):
    assert node_agg_mode in ("sum", "mean")
    w1, b1, w2, b2, w3, b3, w4, b4 = params

    n, d = x.shape
    e, de = edge_attr.shape
    h = w2.shape[0]
    d_out = w4.shape[1]
    din = 2 * d + de
    kp = _round_up(din, 128)
    hp = _round_up(h, 128)
    dop = _round_up(d_out, 128)

    past_nodes = edge_index[0].astype(jnp.int32)
    future_nodes = edge_index[1].astype(jnp.int32)

    # ---- node tiling: balanced tiles, >=2 when possible (v7x has 2 TensorCores) -------
    n_pad8 = _round_up(n, 8)
    if node_tile is not None:
        tn = _round_up(node_tile, 8)
    elif n_pad8 < 16:
        tn = n_pad8
    else:
        num_t = max(2, _cdiv(n_pad8, 256))
        tn = _round_up(_cdiv(n_pad8, num_t), 8)
    n_pad = _round_up(n_pad8, tn)
    num_n = n_pad // tn

    # ---- edge tiling: pick the largest tile fitting a generation-aware VMEM budget ----
    budget = _vmem_budget_bytes()
    if edge_tile is None:
        te = 128
        for cand in (4096, 2048, 1024, 512, 256, 128):
            # pass 1 working set (double-buffered streamed I/O + weights + intermediates)
            p1 = 2 * cand * kp * 2 + 2 * 2 * cand * hp * 2
            p1 += cand * 2 * hp * 4 + 2 * cand * hp * 2 + 2 * cand * hp * 4
            p1 += 2 * (kp * 2 * hp + hp * hp) * 2 + 2 * (3 * hp) * 4
            # pass 2 working set
            p2 = 2 * (2 * cand) * 4 + 2 * 2 * cand * hp * 2
            p2 += tn * 2 * cand * (4 + 2)                         # iota + one-hot
            p2 += tn * hp * 4 + 2 * tn * dop * 4 + 2 * tn * 4
            p2 += 2 * (hp * hp + hp * dop) * 2 + 2 * (hp + dop) * 4
            if max(p1, p2) * 5 // 4 <= budget:
                te = cand
                break
    else:
        te = edge_tile
    te = max(128, min(_round_up(te, 128), _round_up(max(e, 1), 128)))
    e_pad = _round_up(max(e, 1), te)
    num_e = e_pad // te

    # ---- pack [x_future | x_past | edge_attr] lane-dense, bf16, one row per edge ------
    x_bf = x.astype(jnp.bfloat16)
    packed = jnp.concatenate(
        [jnp.take(x_bf, future_nodes, axis=0),
         jnp.take(x_bf, past_nodes, axis=0),
         edge_attr.astype(jnp.bfloat16)], axis=1)                       # (E, 2D+De)
    packed = jnp.pad(packed, ((0, e_pad - e), (0, kp - din)))

    # Message destinations laid out to match fp_all (per edge tile: TE fwd rows, TE bwd).
    # Padded messages scatter to -1 -> never match any node row.
    idx_f = jnp.pad(future_nodes, (0, e_pad - e), constant_values=-1)
    idx_b = jnp.pad(past_nodes, (0, e_pad - e), constant_values=-1)
    idx_all = jnp.stack([idx_f.reshape(num_e, te), idx_b.reshape(num_e, te)],
                        axis=1).reshape(1, 2 * e_pad)

    # Per-node message counts for "mean" (exact, computed once here).
    if node_agg_mode == "mean":
        dst = jnp.concatenate([future_nodes, past_nodes])
        cnt = jnp.maximum(
            jax.ops.segment_sum(jnp.ones((2 * e,), jnp.float32), dst, num_segments=n),
            1.0)
    else:
        cnt = jnp.ones((n,), jnp.float32)
    cnt = jnp.pad(cnt, (0, n_pad - n), constant_values=1.0).reshape(n_pad, 1)

    # ---- weights: stack w1 as [W_fwd | W_bwd]; lane-pad H / D_out; bf16 MXU operands --
    w_fwd = jnp.pad(w1, ((0, kp - din), (0, hp - h)))
    w_bwd = jnp.pad(jnp.concatenate([w1[d:2 * d], w1[:d], w1[2 * d:]], axis=0),
                    ((0, kp - din), (0, hp - h)))
    w1_both = jnp.concatenate([w_fwd, w_bwd], axis=1).astype(jnp.bfloat16)   # (Kp, 2Hp)
    b1p = jnp.pad(jnp.reshape(b1, (1, -1)), ((0, 0), (0, hp - h))).astype(jnp.float32)
    b1_both = jnp.concatenate([b1p, b1p], axis=1)
    w2p = jnp.pad(w2, ((0, hp - h), (0, hp - h))).astype(jnp.bfloat16)
    b2p = jnp.pad(jnp.reshape(b2, (1, -1)), ((0, 0), (0, hp - h))).astype(jnp.float32)
    w3p = jnp.pad(w3, ((0, hp - h), (0, hp - h))).astype(jnp.bfloat16)
    b3p = jnp.pad(jnp.reshape(b3, (1, -1)), ((0, 0), (0, hp - h))).astype(jnp.float32)
    w4p = jnp.pad(w4, ((0, hp - h), (0, dop - d_out))).astype(jnp.bfloat16)
    b4p = jnp.pad(jnp.reshape(b4, (1, -1)), ((0, 0), (0, dop - d_out))).astype(jnp.float32)

    # ---- pass 1: flow MLP over every message exactly once -----------------------------
    fp_all = pl.pallas_call(
        _flow_edge_kernel,
        out_shape=jax.ShapeDtypeStruct((2 * e_pad, hp), jnp.bfloat16),
        grid=(num_e,),
        in_specs=[
            pl.BlockSpec((te, kp), lambda k: (k, 0)),
            pl.BlockSpec((kp, 2 * hp), lambda k: (0, 0)),
            pl.BlockSpec((1, 2 * hp), lambda k: (0, 0)),
            pl.BlockSpec((hp, hp), lambda k: (0, 0)),
            pl.BlockSpec((1, hp), lambda k: (0, 0)),
        ],
        out_specs=pl.BlockSpec((2 * te, hp), lambda k: (k, 0)),
        compiler_params=pltpu.CompilerParams(
            dimension_semantics=("parallel",),
            vmem_limit_bytes=budget),
    )(packed, w1_both, b1_both, w2p, b2p)

    # ---- pass 2: one-hot matmul scatter + node MLP -------------------------------------
    out_padded = pl.pallas_call(
        _scatter_node_kernel,
        out_shape=jax.ShapeDtypeStruct((n_pad, dop), jnp.float32),
        grid=(num_n, num_e),
        in_specs=[
            pl.BlockSpec((1, 2 * te), lambda nn, kk: (0, kk)),   # destinations
            pl.BlockSpec((2 * te, hp), lambda nn, kk: (kk, 0)),  # messages (fwd|bwd)
            pl.BlockSpec((tn, 1), lambda nn, kk: (nn, 0)),       # per-node counts
            pl.BlockSpec((hp, hp), lambda nn, kk: (0, 0)),       # w3
            pl.BlockSpec((1, hp), lambda nn, kk: (0, 0)),        # b3
            pl.BlockSpec((hp, dop), lambda nn, kk: (0, 0)),      # w4
            pl.BlockSpec((1, dop), lambda nn, kk: (0, 0)),       # b4
        ],
        out_specs=pl.BlockSpec((tn, dop), lambda nn, kk: (nn, 0)),
        scratch_shapes=[pltpu.VMEM((tn, hp), jnp.float32)],
        compiler_params=pltpu.CompilerParams(
            dimension_semantics=("parallel", "arbitrary"),
            vmem_limit_bytes=budget),
    )(idx_all, fp_all, cnt, w3p, b3p, w4p, b4p)

    return out_padded[:n, :d_out]


# ------------------------------ reference (pure f32 JAX) ------------------------------
def _reference(x, edge_index, edge_attr, params, node_agg_mode="sum"):
    past_nodes, future_nodes = edge_index[0], edge_index[1]
    w1, b1, w2, b2, w3, b3, w4, b4 = params
    fwd = jnp.concatenate([x[future_nodes], x[past_nodes], edge_attr], axis=1)
    bwd = jnp.concatenate([x[past_nodes], x[future_nodes], edge_attr], axis=1)
    fin = jnp.concatenate([fwd, bwd], axis=0)
    h = jnp.maximum(fin @ w1 + b1, 0.0)
    fp = jnp.maximum(h @ w2 + b2, 0.0)
    idx = jnp.concatenate([future_nodes, past_nodes])
    s = jax.ops.segment_sum(fp, idx, num_segments=x.shape[0])
    if node_agg_mode == "sum":
        agg = s
    else:
        c = jax.ops.segment_sum(jnp.ones((fp.shape[0], 1)), idx, num_segments=x.shape[0])
        agg = s / jnp.maximum(c, 1.0)
    h2 = jnp.maximum(agg @ w3 + b3, 0.0)
    return h2 @ w4 + b4


def make_params(key, d_node, d_edge, hidden, d_out):
    din = 2 * d_node + d_edge
    ks = jax.random.split(key, 4)
    w1 = jax.random.normal(ks[0], (din, hidden), jnp.float32) * 0.1
    w2 = jax.random.normal(ks[1], (hidden, hidden), jnp.float32) * 0.1
    w3 = jax.random.normal(ks[2], (hidden, hidden), jnp.float32) * 0.1
    w4 = jax.random.normal(ks[3], (hidden, d_out), jnp.float32) * 0.1
    b1 = jnp.full((1, hidden), 0.01, jnp.float32)
    b2 = jnp.full((1, hidden), 0.02, jnp.float32)
    b3 = jnp.full((1, hidden), 0.03, jnp.float32)
    b4 = jnp.full((1, d_out), 0.04, jnp.float32)
    return (w1, b1, w2, b2, w3, b3, w4, b4)


if __name__ == "__main__":
    D, De, H, D_OUT = 32, 16, 32, 32
    key = jax.random.PRNGKey(0)
    k1, k2, kw = jax.random.split(key, 3)
    params = make_params(kw, D, De, H, D_OUT)
    TOL = dict(atol=5e-2, rtol=5e-2)   # bf16 MXU operands vs pure-f32 reference

    def make_graph(k, n_nodes, n_edges):
        ka, kb, kc, kd = jax.random.split(k, 4)
        x = jax.random.normal(ka, (n_nodes, D), jnp.float32)
        ea = jax.random.normal(kb, (n_edges, De), jnp.float32)
        p = jax.random.randint(kc, (n_edges,), 0, n_nodes, jnp.int32)
        f = jax.random.randint(kd, (n_edges,), 0, n_nodes, jnp.int32)
        return x, jnp.stack([p, f], axis=0), ea

    # --- small graph, default tiling, both aggregation modes ---
    x, ei, ea = make_graph(k1, 8, 8)
    for mode in ("sum", "mean"):
        out = jax.block_until_ready(
            uniform_agg_node_forward(x, ei, ea, params, node_agg_mode=mode))
        ref = _reference(x, ei, ea, params, node_agg_mode=mode)
        assert out.shape == (8, D_OUT)
        assert jnp.allclose(out, ref, **TOL), f"{mode} mismatch (small graph)"

    # --- larger graph with forced small tiles: exercises multi node-tile ("parallel")
    #     and multi edge-tile ("arbitrary" accumulation) paths ---
    x2, ei2, ea2 = make_graph(k2, 20, 300)
    for mode in ("sum", "mean"):
        out = jax.block_until_ready(
            uniform_agg_node_forward(x2, ei2, ea2, params, node_agg_mode=mode,
                                     node_tile=8, edge_tile=128))
        ref = _reference(x2, ei2, ea2, params, node_agg_mode=mode)
        assert out.shape == (20, D_OUT)
        assert jnp.allclose(out, ref, **TOL), f"{mode} mismatch (tiled graph)"

    print("KERNEL_OK")
</pallas_src>

<mosaic_0001>
module attributes {stable_mosaic.version = 11 : i64} {
  func.func @_flow_edge_kernel(%arg0: i32, %arg1: memref<128x128xbf16, #tpu.memory_space<vmem>>, %arg2: memref<128x256xbf16, #tpu.memory_space<vmem>>, %arg3: memref<1x256xf32, #tpu.memory_space<vmem>>, %arg4: memref<128x128xbf16, #tpu.memory_space<vmem>>, %arg5: memref<1x128xf32, #tpu.memory_space<vmem>>, %arg6: memref<256x128xbf16, #tpu.memory_space<vmem>>) attributes {dimension_semantics = [#tpu.dimension_semantics<parallel>], iteration_bounds = array<i64: 1>, scalar_prefetch = 0 : i64, scratch_operands = 0 : i64, tpu.core_type = #tpu.core_type<tc>, window_params = [{transform_indices = @transform_0, window_bounds = array<i64: 128, 128>}, {pipeline_mode = #tpu.pipeline_mode<synchronous>, transform_indices = @transform_1, window_bounds = array<i64: 128, 256>}, {pipeline_mode = #tpu.pipeline_mode<synchronous>, transform_indices = @transform_2, window_bounds = array<i64: 1, 256>}, {pipeline_mode = #tpu.pipeline_mode<synchronous>, transform_indices = @transform_3, window_bounds = array<i64: 128, 128>}, {pipeline_mode = #tpu.pipeline_mode<synchronous>, transform_indices = @transform_4, window_bounds = array<i64: 1, 128>}, {transform_indices = @transform_5, window_bounds = array<i64: 256, 128>}]} {
    %c0 = arith.constant 0 : index
    %c0_0 = arith.constant 0 : index
    %0 = vector.load %arg1[%c0, %c0_0] : memref<128x128xbf16, #tpu.memory_space<vmem>>, vector<128x128xbf16>
    %c0_1 = arith.constant 0 : index
    %c0_2 = arith.constant 0 : index
    %1 = vector.load %arg2[%c0_1, %c0_2] : memref<128x256xbf16, #tpu.memory_space<vmem>>, vector<128x256xbf16>
    %cst = arith.constant dense<0.000000e+00> : vector<128x256xf32>
    %2 = tpu.matmul %0, %1, %cst {dimension_numbers = #tpu.dot_dimension_numbers<[1], [0], [0], [1], [0, 0, 1, 1], [], []>} : vector<128x128xbf16>, vector<128x256xbf16>, vector<128x256xf32> -> vector<128x256xf32>
    %c0_3 = arith.constant 0 : index
    %c0_4 = arith.constant 0 : index
    %3 = vector.load %arg3[%c0_3, %c0_4] : memref<1x256xf32, #tpu.memory_space<vmem>>, vector<1x256xf32>
    %4 = vector.broadcast %3 : vector<1x256xf32> to vector<128x256xf32>
    %5 = arith.addf %2, %4 : vector<128x256xf32>
    %cst_5 = arith.constant 0.000000e+00 : f32
    %6 = vector.broadcast %cst_5 : f32 to vector<128x256xf32>
    %7 = arith.maximumf %5, %6 : vector<128x256xf32>
    %c0_6 = arith.constant 0 : index
    %c0_7 = arith.constant 0 : index
    %8 = vector.load %arg4[%c0_6, %c0_7] : memref<128x128xbf16, #tpu.memory_space<vmem>>, vector<128x128xbf16>
    %c0_8 = arith.constant 0 : index
    %c0_9 = arith.constant 0 : index
    %9 = vector.load %arg5[%c0_8, %c0_9] : memref<1x128xf32, #tpu.memory_space<vmem>>, vector<1x128xf32>
    %10 = vector.extract_strided_slice %7 {offsets = [0, 0], sizes = [128, 128], strides = [1, 1]} : vector<128x256xf32> to vector<128x128xf32>
    %11 = arith.truncf %10 : vector<128x128xf32> to vector<128x128xbf16>
    %cst_10 = arith.constant dense<0.000000e+00> : vector<128x128xf32>
    %12 = tpu.matmul %11, %8, %cst_10 {dimension_numbers = #tpu.dot_dimension_numbers<[1], [0], [0], [1], [0, 0, 1, 1], [], []>} : vector<128x128xbf16>, vector<128x128xbf16>, vector<128x128xf32> -> vector<128x128xf32>
    %13 = vector.broadcast %9 : vector<1x128xf32> to vector<128x128xf32>
    %14 = arith.addf %12, %13 : vector<128x128xf32>
    %cst_11 = arith.constant 0.000000e+00 : f32
    %15 = vector.broadcast %cst_11 : f32 to vector<128x128xf32>
    %16 = arith.maximumf %14, %15 : vector<128x128xf32>
    %17 = vector.extract_strided_slice %7 {offsets = [0, 128], sizes = [128, 128], strides = [1, 1]} : vector<128x256xf32> to vector<128x128xf32>
    %18 = arith.truncf %17 : vector<128x128xf32> to vector<128x128xbf16>
    %cst_12 = arith.constant dense<0.000000e+00> : vector<128x128xf32>
    %19 = tpu.matmul %18, %8, %cst_12 {dimension_numbers = #tpu.dot_dimension_numbers<[1], [0], [0], [1], [0, 0, 1, 1], [], []>} : vector<128x128xbf16>, vector<128x128xbf16>, vector<128x128xf32> -> vector<128x128xf32>
    %20 = vector.broadcast %9 : vector<1x128xf32> to vector<128x128xf32>
    %21 = arith.addf %19, %20 : vector<128x128xf32>
    %cst_13 = arith.constant 0.000000e+00 : f32
    %22 = vector.broadcast %cst_13 : f32 to vector<128x128xf32>
    %23 = arith.maximumf %21, %22 : vector<128x128xf32>
    %24 = arith.truncf %16 : vector<128x128xf32> to vector<128x128xbf16>
    %c0_14 = arith.constant 0 : index
    %c0_15 = arith.constant 0 : index
    %25 = vector.load %arg6[%c0_14, %c0_15] : memref<256x128xbf16, #tpu.memory_space<vmem>>, vector<128x128xbf16>
    tpu.vector_store %arg6[%c0_14, %c0_15], %24 {strides = array<i32>} : memref<256x128xbf16, #tpu.memory_space<vmem>>, vector<128x128xbf16>,
    %26 = arith.truncf %23 : vector<128x128xf32> to vector<128x128xbf16>
    %c128 = arith.constant 128 : index
    %c0_16 = arith.constant 0 : index
    %27 = vector.load %arg6[%c128, %c0_16] : memref<256x128xbf16, #tpu.memory_space<vmem>>, vector<128x128xbf16>
    tpu.vector_store %arg6[%c128, %c0_16], %26 {strides = array<i32>} : memref<256x128xbf16, #tpu.memory_space<vmem>>, vector<128x128xbf16>,
    return
  }
  func.func @transform_0(%arg0: i32) -> (i32, i32) {
    %c0_i32 = arith.constant 0 : i32
    %c0_i32_0 = arith.constant 0 : i32
    return %arg0, %c0_i32 : i32, i32
  }
  func.func @transform_1(%arg0: i32) -> (i32, i32) {
    %c0_i32 = arith.constant 0 : i32
    %c0_i32_0 = arith.constant 0 : i32
    %c0_i32_1 = arith.constant 0 : i32
    return %c0_i32, %c0_i32_0 : i32, i32
  }
  func.func @transform_2(%arg0: i32) -> (i32, i32) {
    %c0_i32 = arith.constant 0 : i32
    %c0_i32_0 = arith.constant 0 : i32
    %c0_i32_1 = arith.constant 0 : i32
    return %c0_i32, %c0_i32_0 : i32, i32
  }
  func.func @transform_3(%arg0: i32) -> (i32, i32) {
    %c0_i32 = arith.constant 0 : i32
    %c0_i32_0 = arith.constant 0 : i32
    %c0_i32_1 = arith.constant 0 : i32
    return %c0_i32, %c0_i32_0 : i32, i32
  }
  func.func @transform_4(%arg0: i32) -> (i32, i32) {
    %c0_i32 = arith.constant 0 : i32
    %c0_i32_0 = arith.constant 0 : i32
    %c0_i32_1 = arith.constant 0 : i32
    return %c0_i32, %c0_i32_0 : i32, i32
  }
  func.func @transform_5(%arg0: i32) -> (i32, i32) {
    %c0_i32 = arith.constant 0 : i32
    %c0_i32_0 = arith.constant 0 : i32
    return %arg0, %c0_i32 : i32, i32
  }
}

</mosaic_0001>

<bundles_post_ra>
// kernel: tpu_custom_call.1
= control target key start
LH: loop header
LB: loop body
LE: loop exit
PB: predicated region body
PF: predicated region fallthrough
CT: control target
= control target key end

     0   :  { %10 = vsyncpa [#allocation3], 0  ;;  %s1542_s0 = inlined_call_operand.hbm [shape: bf16[128,128], index: 0, kind: input, shape index: {}]   ;;  %s1543_s1 = inlined_call_operand.hbm [shape: bf16[128,256], index: 1, kind: input, shape index: {}]   ;;  %s1544_s2 = inlined_call_operand.vmem [shape: f32[1,256], index: 2, kind: input, shape index: {}]   ;;  %s1545_s3 = inlined_call_operand.hbm [shape: bf16[128,128], index: 3, kind: input, shape index: {}]   ;;  %s1546_s4 = inlined_call_operand.vmem [shape: f32[1,128], index: 4, kind: input, shape index: {}]   ;;  %s1547_s5 = inlined_call_operand.hbm [shape: bf16[256,128], index: 5, kind: output, shape index: {}]  }
   0x1   :  { %11 = vsyncpa [#allocation6], 0 }
   0x2   :  { %12 = vsyncpa [#allocation4], 0  ;;  %s1302_s18 = smov [#allocation5]   ;;  %s1208_s22 = scalar_lea.hbm %s1543_s1, 2048 }
   0x3   :  { %s30_s19 = sshll.u32 %s1302_s18, 4  ;;  %p1209_p0 = scmp.ne.s32.totalorder %s1543_s1, %s1208_s22  ;;  %s31_s19 = int_to_ptr.vmem [resolvable:$true] %s30_s19 }
   0x4   :  { %p1212_p1 = scmp.lt.u32.totalorder %s1208_s22, %s1543_s1 }
   0x6   :  { %p1214_p2 = pnand %p1212_p1, %p1209_p0 }
   0x8   :  { %1217 = shalt.err (!%p1214_p2)
}
   0x9   :  { %s1218_s27 = scalar_lea.vmem %s31_s19, 2048  ;;  %p1223_p4 = scmp.lt.s32.totalorder %s31_s19, %s31_s19 }
   0xa   :  { %p1219_p3 = scmp.ne.s32.totalorder %s31_s19, %s1218_s27  ;;  %p1224_p5 = scmp.lt.s32.totalorder %s1218_s27, %s1218_s27 }
   0xc   :  { %p1225_p6 = por %p1224_p5, %p1223_p4 }
   0xe   :  { %p1226_p7 = pnand %p1225_p6, %p1219_p3 }
  0x10   :  { %1229 = shalt.err (!%p1226_p7)
}
  0x11   :  { %s1303_s28 = smov 128   ;;  %s1304_s29 = smov 8  }
  0x12   :  { %36 = dma.hbm_to_vmem [thread:$0]  %s1543_s1, 2048, %s31_s19, [#allocation6], %s1303_s28, %s1303_s28, %s1304_s29  }
  0x13   :  { %s1305_s7 = smov [#allocation2]   ;;  %s1230_s11 = scalar_lea.hbm %s1542_s0, 1024 }
  0x14   :  { %s18_s8 = sshll.u32 %s1305_s7, 4  ;;  %p1231_p8 = scmp.ne.s32.totalorder %s1542_s0, %s1230_s11  ;;  %s19_s8 = int_to_ptr.vmem [resolvable:$true] %s18_s8 }
  0x15   :  { %p1234_p9 = scmp.lt.u32.totalorder %s1230_s11, %s1542_s0 }
  0x17   :  { %p1236_p10 = pnand %p1234_p9, %p1231_p8 }
  0x19   :  { %1239 = shalt.err (!%p1236_p10)
}
  0x1a   :  { %s1240_s16 = scalar_lea.vmem %s19_s8, 1024  ;;  %p1245_p12 = scmp.lt.s32.totalorder %s19_s8, %s19_s8 }
  0x1b   :  { %p1241_p11 = scmp.ne.s32.totalorder %s19_s8, %s1240_s16  ;;  %p1246_p13 = scmp.lt.s32.totalorder %s1240_s16, %s1240_s16 }
  0x1d   :  { %p1247_p0 = por %p1246_p13, %p1245_p12 }
  0x1f   :  { %p1248_p1 = pnand %p1247_p0, %p1241_p11 }
  0x21   :  { %1251 = shalt.err (!%p1248_p1)
}
  0x22   :  { %s1306_s1 = smov 64   ;;  %s1307_s17 = smov 4  }
  0x23   :  { %24 = dma.hbm_to_vmem [thread:$0]  %s1542_s0, 1024, %s19_s8, [#allocation3], %s1306_s1, %s1306_s1, %s1307_s17  }
  0x24   :  { %s1308_s20 = smov [#allocation7]   ;;  %s1252_s24 = scalar_lea.hbm %s1545_s3, 1024 }
  0x25   :  { %s44_s21 = sshll.u32 %s1308_s20, 4  ;;  %p1253_p2 = scmp.ne.s32.totalorder %s1545_s3, %s1252_s24  ;;  %s45_s21 = int_to_ptr.vmem [resolvable:$true] %s44_s21 }
  0x26   :  { %p1256_p3 = scmp.lt.u32.totalorder %s1252_s24, %s1545_s3 }
  0x28   :  { %p1258_p4 = pnand %p1256_p3, %p1253_p2 }
  0x2a   :  { %1261 = shalt.err (!%p1258_p4)
}
  0x2b   :  { %s1262_s29 = scalar_lea.vmem %s45_s21, 1024  ;;  %p1267_p6 = scmp.lt.s32.totalorder %s45_s21, %s45_s21 }
  0x2c   :  { %p1263_p5 = scmp.ne.s32.totalorder %s45_s21, %s1262_s29  ;;  %p1268_p7 = scmp.lt.s32.totalorder %s1262_s29, %s1262_s29 }
  0x2e   :  { %p1269_p8 = por %p1268_p7, %p1267_p6 }
  0x30   :  { %p1270_p9 = pnand %p1269_p8, %p1263_p5 }
  0x32   :  { %1273 = shalt.err (!%p1270_p9)
}
  0x33   :  { %50 = dma.hbm_to_vmem [thread:$0]  %s1545_s3, 1024, %s45_s21, [#allocation6], %s1306_s1, %s1306_s1, %s1307_s17  }
  0x34   :  { %1296 = dma.done.wait [#allocation3], 1024  }
  0x35   :  { %1297 = vsyncadd [#allocation3], 4294966272 }
  0x36   :  { %1298 = dma.done.wait [#allocation6], 3072  }
  0x37   :  { %1299 = vsyncadd [#allocation6], 4294964224  ;;  %v1309_v0 = vmov 0   ;;  %v1168_v1 = vld [vmem:[#allocation5 + $0x4] ss:$8 sps:$4 sm:$0xff]   ;;  %v1390_v18 = vld [vmem:[#allocation7 + $0x10] sm:$0xff]   ;;  %v97_v33 = vlaneseq }
  0x38   :  { %267 = vmatprep.mubr.bf16.mxu0 %v1309_v0  ;;  %v1170_v2 = vld [vmem:[#allocation5] ss:$8 sps:$4 sm:$0xff]   ;;  %235 = vmatprep.subr.bf16.mxu0 %v1168_v1  ;;  %v1171_v3 = vld [vmem:[#allocation5 + $0x14] ss:$8 sps:$4 sm:$0xff]   ;;  %v1173_v4 = vld [vmem:[#allocation5 + $0x10] ss:$8 sps:$4 sm:$0xff]  }
  0x39   :  { %236 = vmatpush1.bf16.msra.mxu0 %v1170_v2  ;;  %v1174_v5 = vld [vmem:[#allocation5 + $0x24] ss:$8 sps:$4 sm:$0xff]   ;;  %v1176_v6 = vld [vmem:[#allocation5 + $0x20] ss:$8 sps:$4 sm:$0xff]   ;;  %v1177_v7 = vld [vmem:[#allocation5 + $0x34] ss:$8 sps:$4 sm:$0xff]  }
  0x3a   :  { %237 = vmatprep.subr.bf16.mxu0 %v1171_v3  ;;  %v1179_v8 = vld [vmem:[#allocation5 + $0x30] ss:$8 sps:$4 sm:$0xff]   ;;  %v1180_v9 = vld [vmem:[#allocation5 + $0x44] ss:$8 sps:$4 sm:$0xff]   ;;  %v1182_v10 = vld [vmem:[#allocation5 + $0x40] ss:$8 sps:$4 sm:$0xff]  }
  0x3b   :  { %v1183_v11 = vld [vmem:[#allocation5 + $0x54] ss:$8 sps:$4 sm:$0xff]   ;;  %v1185_v12 = vld [vmem:[#allocation5 + $0x50] ss:$8 sps:$4 sm:$0xff]   ;;  %v1186_v13 = vld [vmem:[#allocation5 + $0x64] ss:$8 sps:$4 sm:$0xff]  }
  0x3c   :  { %v1384_v14 = vld [vmem:[#allocation7] sm:$0xff]   ;;  %v1386_v15 = vld [vmem:[#allocation7 + $0x8] sm:$0xff]   ;;  %v1189_v17 = vld [vmem:[#allocation5 + $0x74] ss:$8 sps:$4 sm:$0xff]   ;;  %v98_v34 = vshrl.u32 %v97_v33, 7 }
  0x3d   :  { %238 = vmatpush1.bf16.msra.mxu0 %v1173_v4  ;;  %v1188_v16 = vld [vmem:[#allocation5 + $0x60] ss:$8 sps:$4 sm:$0xff]   ;;  %1095 = vmatprep.subr.bf16.mxu1 %v1384_v14  ;;  %v1191_v19 = vld [vmem:[#allocation5 + $0x70] ss:$8 sps:$4 sm:$0xff]  }
  0x3e   :  { %239 = vmatprep.subr.bf16.mxu0 %v1174_v5  ;;  %1096 = vmatpush3.bf16.msra.mxu1 %v1384_v14  ;;  %v1395_v20 = vld [vmem:[#allocation7 + $0x18] sm:$0xff]   ;;  %v1192_v21 = vld [vmem:[#allocation2] sm:$0xff]   ;;  %v1193_v22 = vld [vmem:[#allocation2 + $0x8] sm:$0xff]   ;;  %v99_v35 = vsub.s32 0, %v98_v34  ;;  %v103_v37 = vsub.s32 1, %v98_v34 }
  0x3f   :  { %1097 = vmatprep.subr.bf16.mxu1 %v1386_v15  ;;  %v1194_v23 = vld [vmem:[#allocation2 + $0x10] sm:$0xff]   ;;  %v1195_v24 = vld [vmem:[#allocation2 + $0x18] sm:$0xff]   ;;  %v1196_v25 = vld [vmem:[#allocation2 + $0x20] sm:$0xff]  }
  0x40   :  { %v1197_v26 = vld [vmem:[#allocation2 + $0x28] sm:$0xff]   ;;  %v1198_v27 = vld [vmem:[#allocation2 + $0x30] sm:$0xff]   ;;  %v1199_v28 = vld [vmem:[#allocation2 + $0x38] sm:$0xff]  }
  0x41   :  { %240 = vmatpush1.bf16.msra.mxu0 %v1176_v6  ;;  %v1407_v29 = vld [vmem:[#allocation7 + $0x20] sm:$0xff]   ;;  %v1411_v30 = vld [vmem:[#allocation7 + $0x28] sm:$0xff]   ;;  %v1415_v31 = vld [vmem:[#allocation7 + $0x30] sm:$0xff]  }
  0x42   :  { %241 = vmatprep.subr.bf16.mxu0 %v1177_v7  ;;  %1098 = vmatpush3.bf16.msra.mxu1 %v1386_v15  ;;  %v1419_v32 = vld [vmem:[#allocation7 + $0x38] sm:$0xff]   ;;  %v95_v36 = vld [vmem:[%s1544_s2] sm:$0x3] }
  0x43   :  { %1099 = vmatprep.subr.bf16.mxu1 %v1390_v18  ;;  %v1427_v38 = vrot.slane %v95_v36, %v99_v35  ;;  %v1429_v39 = vrot.slane %v95_v36, %v103_v37 }
  0x45   :  { %242 = vmatpush1.bf16.msra.mxu0 %v1179_v8 }
  0x46   :  { %243 = vmatprep.subr.bf16.mxu0 %v1180_v9  ;;  %1100 = vmatpush3.bf16.msra.mxu1 %v1390_v18 }
  0x47   :  { %1101 = vmatprep.subr.bf16.mxu1 %v1395_v20 }
  0x49   :  { %244 = vmatpush1.bf16.msra.mxu0 %v1182_v10 }
  0x4a   :  { %245 = vmatprep.subr.bf16.mxu0 %v1183_v11  ;;  %1102 = vmatpush3.bf16.msra.mxu1 %v1395_v20 }
  0x4b   :  { %1103 = vmatprep.subr.bf16.mxu1 %v1407_v29 }
  0x4d   :  { %246 = vmatpush1.bf16.msra.mxu0 %v1185_v12 }
  0x4e   :  { %247 = vmatprep.subr.bf16.mxu0 %v1186_v13  ;;  %1104 = vmatpush3.bf16.msra.mxu1 %v1407_v29 }
  0x4f   :  { %1105 = vmatprep.subr.bf16.mxu1 %v1411_v30 }
  0x51   :  { %248 = vmatpush1.bf16.msra.mxu0 %v1188_v16 }
  0x52   :  { %249 = vmatprep.subr.bf16.mxu0 %v1189_v17  ;;  %1106 = vmatpush3.bf16.msra.mxu1 %v1411_v30 }
  0x53   :  { %1107 = vmatprep.subr.bf16.mxu1 %v1415_v31 }
  0x55   :  { %250 = vmatpush1.bf16.msra.mxu0 %v1191_v19 }
  0x56   :  { %1108 = vmatpush3.bf16.msra.mxu1 %v1415_v31 }
  0x57   :  { %1109 = vmatprep.subr.bf16.mxu1 %v1419_v32 }
  0x58   :  { %268 = vmatmul.mubr.bf16.vlgmr.msra.gmra.mrb[0].mxu0 %v1192_v21 }
  0x59   :  { %277 = vmatprep.mubr.bf16.mxu0 %v1309_v0 }
  0x5a   :  { %1110 = vmatpush3.bf16.msra.mxu1 %v1419_v32 }
  0x5b   :  { %1127 = vmatprep.subr.bf16.mxu1 %v1384_v14 }
  0x60   :  { %278 = vmatmul.mubr.bf16.gmra.mrb[4].mxu0 %v1193_v22 }
  0x61   :  { %287 = vmatprep.mubr.bf16.mxu0 %v1309_v0 }
  0x68   :  { %288 = vmatmul.mubr.bf16.gmra.mrb[8].mxu0 %v1194_v23 }
  0x69   :  { %297 = vmatprep.mubr.bf16.mxu0 %v1309_v0 }
  0x70   :  { %298 = vmatmul.mubr.bf16.gmra.mrb[12].mxu0 %v1195_v24 }
  0x71   :  { %307 = vmatprep.mubr.bf16.mxu0 %v1309_v0 }
  0x78   :  { %308 = vmatmul.mubr.bf16.gmra.mrb[16].mxu0 %v1196_v25 }
  0x79   :  { %317 = vmatprep.mubr.bf16.mxu0 %v1309_v0 }
  0x80   :  { %318 = vmatmul.mubr.bf16.gmra.mrb[20].mxu0 %v1197_v26 }
  0x81   :  { %327 = vmatprep.mubr.bf16.mxu0 %v1309_v0 }
  0x88   :  { %328 = vmatmul.mubr.bf16.gmra.mrb[24].mxu0 %v1198_v27 }
  0x89   :  { %337 = vmatprep.mubr.bf16.mxu0 %v1309_v0 }
  0x90   :  { %338 = vmatmul.mubr.bf16.gmra.mrb[28].mxu0 %v1199_v28 }
 0x12b   :  { %v269_v40 = vpop.f32.mrb[0].mxu0 }
 0x12c   :  { %v270_v41 = vadd.f32 %v269_v40, %v1427_v38  ;;  %v271_v42 = vpop.f32.mrb[1].mxu0 }
 0x12d   :  { %v272_v43 = vadd.f32 %v271_v42, %v1429_v39  ;;  %v273_v44 = vpop.f32.mrb[2].mxu0 }
 0x12e   :  { %v274_v45 = vadd.f32 %v273_v44, %v1427_v38  ;;  %v275_v46 = vpop.f32.mrb[3].mxu0  ;;  %v348_v48 = vmax.f32 %v270_v41, 0.0 }
 0x12f   :  { %v276_v47 = vadd.f32 %v275_v46, %v1429_v39  ;;  %v349_v50 = vmax.f32 %v272_v43, 0.0 }
 0x130   :  { %v350_v49 = vmax.f32 %v274_v45, 0.0 }
 0x131   :  { %v351_v51 = vmax.f32 %v276_v47, 0.0 }
 0x132   :  { %v397_v52 = vpack.c.bf16 %v350_v49, %v348_v48 }
 0x133   :  { %v1435_v53 = vpack.c.bf16 %v351_v51, %v349_v50  ;;  %v279_v54 = vpop.f32.mrb[4].mxu0 }
 0x134   :  { %v280_v55 = vadd.f32 %v279_v54, %v1427_v38  ;;  %v281_v56 = vpop.f32.mrb[5].mxu0  ;;  %1111 = vmatprep.mubr.bf16.mxu1 %v397_v52 }
 0x135   :  { %v282_v57 = vadd.f32 %v281_v56, %v1429_v39  ;;  %v283_v58 = vpop.f32.mrb[6].mxu0 }
 0x136   :  { %v284_v59 = vadd.f32 %v283_v58, %v1427_v38  ;;  %v285_v60 = vpop.f32.mrb[7].mxu0  ;;  %v352_v62 = vmax.f32 %v280_v55, 0.0 }
 0x137   :  { %v286_v61 = vadd.f32 %v285_v60, %v1429_v39  ;;  %v353_v0 = vmax.f32 %v282_v57, 0.0 }
 0x138   :  { %v354_v63 = vmax.f32 %v284_v59, 0.0 }
 0x139   :  { %v355_v1 = vmax.f32 %v286_v61, 0.0 }
 0x13a   :  { %v398_v2 = vpack.c.bf16 %v354_v63, %v352_v62 }
 0x13b   :  { %v1441_v3 = vpack.c.bf16 %v355_v1, %v353_v0  ;;  %v289_v4 = vpop.f32.mrb[8].mxu0 }
 0x13c   :  { %v290_v5 = vadd.f32 %v289_v4, %v1427_v38  ;;  %v291_v6 = vpop.f32.mrb[9].mxu0  ;;  %1112 = vmatmul.mubr.bf16.vlgmr.msra.gmra.mrb[0].mxu1 %v398_v2 }
 0x13d   :  { %v292_v7 = vadd.f32 %v291_v6, %v1429_v39  ;;  %v293_v8 = vpop.f32.mrb[10].mxu0  ;;  %1128 = vmatpush3.bf16.msra.mxu1 %v1384_v14 }
 0x13e   :  { %v294_v9 = vadd.f32 %v293_v8, %v1427_v38  ;;  %v295_v10 = vpop.f32.mrb[11].mxu0  ;;  %1129 = vmatprep.subr.bf16.mxu1 %v1386_v15  ;;  %v356_v12 = vmax.f32 %v290_v5, 0.0 }
 0x13f   :  { %v296_v11 = vadd.f32 %v295_v10, %v1429_v39  ;;  %v357_v16 = vmax.f32 %v292_v7, 0.0 }
 0x140   :  { %v358_v13 = vmax.f32 %v294_v9, 0.0 }
 0x141   :  { %v359_v17 = vmax.f32 %v296_v11, 0.0  ;;  %1130 = vmatpush3.bf16.msra.mxu1 %v1386_v15 }
 0x142   :  { %v399_v19 = vpack.c.bf16 %v358_v13, %v356_v12  ;;  %1131 = vmatprep.subr.bf16.mxu1 %v1390_v18 }
 0x143   :  { %v1451_v21 = vpack.c.bf16 %v359_v17, %v357_v16  ;;  %v299_v22 = vpop.f32.mrb[12].mxu0 }
 0x144   :  { %v300_v14 = vadd.f32 %v299_v22, %v1427_v38  ;;  %v301_v23 = vpop.f32.mrb[13].mxu0  ;;  %1115 = vmatprep.mubr.bf16.mxu1 %v399_v19 }
 0x145   :  { %v302_v24 = vadd.f32 %v301_v23, %v1429_v39  ;;  %v303_v25 = vpop.f32.mrb[14].mxu0  ;;  %1132 = vmatpush3.bf16.msra.mxu1 %v1390_v18 }
 0x146   :  { %v304_v26 = vadd.f32 %v303_v25, %v1427_v38  ;;  %v305_v27 = vpop.f32.mrb[15].mxu0  ;;  %1133 = vmatprep.subr.bf16.mxu1 %v1395_v20  ;;  %v360_v28 = vmax.f32 %v300_v14, 0.0 }
 0x147   :  { %v306_v15 = vadd.f32 %v305_v27, %v1429_v39  ;;  %v361_v34 = vmax.f32 %v302_v24, 0.0 }
 0x148   :  { %v362_v33 = vmax.f32 %v304_v26, 0.0 }
 0x149   :  { %v363_v35 = vmax.f32 %v306_v15, 0.0  ;;  %1134 = vmatpush3.bf16.msra.mxu1 %v1395_v20 }
 0x14a   :  { %v400_v36 = vpack.c.bf16 %v362_v33, %v360_v28  ;;  %1135 = vmatprep.subr.bf16.mxu1 %v1407_v29 }
 0x14b   :  { %v1461_v37 = vpack.c.bf16 %v363_v35, %v361_v34  ;;  %v309_v40 = vpop.f32.mrb[16].mxu0 }
 0x14c   :  { %v310_v18 = vadd.f32 %v309_v40, %v1427_v38  ;;  %v311_v41 = vpop.f32.mrb[17].mxu0  ;;  %1116 = vmatmul.mubr.bf16.gmra.mrb[4].mxu1 %v400_v36 }
 0x14d   :  { %v312_v42 = vadd.f32 %v311_v41, %v1429_v39  ;;  %v313_v43 = vpop.f32.mrb[18].mxu0  ;;  %1136 = vmatpush3.bf16.msra.mxu1 %v1407_v29 }
 0x14e   :  { %v314_v44 = vadd.f32 %v313_v43, %v1427_v38  ;;  %v315_v45 = vpop.f32.mrb[19].mxu0  ;;  %1137 = vmatprep.subr.bf16.mxu1 %v1411_v30  ;;  %v364_v46 = vmax.f32 %v310_v18, 0.0 }
 0x14f   :  { %v316_v20 = vadd.f32 %v315_v45, %v1429_v39  ;;  %v365_v48 = vmax.f32 %v312_v42, 0.0 }
 0x150   :  { %v366_v47 = vmax.f32 %v314_v44, 0.0 }
 0x151   :  { %v367_v49 = vmax.f32 %v316_v20, 0.0  ;;  %1138 = vmatpush3.bf16.msra.mxu1 %v1411_v30 }
 0x152   :  { %v401_v50 = vpack.c.bf16 %v366_v47, %v364_v46  ;;  %1139 = vmatprep.subr.bf16.mxu1 %v1415_v31 }
 0x153   :  { %v576_v51 = vpack.c.bf16 %v367_v49, %v365_v48  ;;  %v319_v52 = vpop.f32.mrb[20].mxu0 }
 0x154   :  { %v320_v29 = vadd.f32 %v319_v52, %v1427_v38  ;;  %v321_v54 = vpop.f32.mrb[21].mxu0  ;;  %1119 = vmatprep.mubr.bf16.mxu1 %v401_v50 }
 0x155   :  { %v322_v55 = vadd.f32 %v321_v54, %v1429_v39  ;;  %v323_v56 = vpop.f32.mrb[22].mxu0  ;;  %1140 = vmatpush3.bf16.msra.mxu1 %v1415_v31 }
 0x156   :  { %v324_v57 = vadd.f32 %v323_v56, %v1427_v38  ;;  %v325_v58 = vpop.f32.mrb[23].mxu0  ;;  %1141 = vmatprep.subr.bf16.mxu1 %v1419_v32  ;;  %v368_v59 = vmax.f32 %v320_v29, 0.0 }
 0x157   :  { %v326_v30 = vadd.f32 %v325_v58, %v1429_v39  ;;  %v369_v61 = vmax.f32 %v322_v55, 0.0 }
 0x158   :  { %v370_v60 = vmax.f32 %v324_v57, 0.0 }
 0x159   :  { %v371_v62 = vmax.f32 %v326_v30, 0.0  ;;  %1142 = vmatpush3.bf16.msra.mxu1 %v1419_v32 }
 0x15a   :  { %v402_v63 = vpack.c.bf16 %v370_v60, %v368_v59 }
 0x15b   :  { %v577_v0 = vpack.c.bf16 %v371_v62, %v369_v61  ;;  %v329_v1 = vpop.f32.mrb[24].mxu0 }
 0x15c   :  { %v330_v2 = vadd.f32 %v329_v1, %v1427_v38  ;;  %v331_v4 = vpop.f32.mrb[25].mxu0  ;;  %1120 = vmatmul.mubr.bf16.gmra.mrb[8].mxu1 %v402_v63 }
 0x15d   :  { %v332_v31 = vadd.f32 %v331_v4, %v1429_v39  ;;  %v333_v5 = vpop.f32.mrb[26].mxu0 }
 0x15e   :  { %v334_v6 = vadd.f32 %v333_v5, %v1427_v38  ;;  %v335_v7 = vpop.f32.mrb[27].mxu0  ;;  %v372_v9 = vmax.f32 %v330_v2, 0.0 }
 0x15f   :  { %v336_v8 = vadd.f32 %v335_v7, %v1429_v39  ;;  %v373_v11 = vmax.f32 %v332_v31, 0.0 }
 0x160   :  { %v374_v10 = vmax.f32 %v334_v6, 0.0 }
 0x161   :  { %v375_v12 = vmax.f32 %v336_v8, 0.0 }
 0x162   :  { %v403_v32 = vpack.c.bf16 %v374_v10, %v372_v9 }
 0x163   :  { %v578_v13 = vpack.c.bf16 %v375_v12, %v373_v11  ;;  %v339_v16 = vpop.f32.mrb[28].mxu0 }
 0x164   :  { %v340_v17 = vadd.f32 %v339_v16, %v1427_v38  ;;  %v341_v19 = vpop.f32.mrb[29].mxu0  ;;  %1123 = vmatprep.mubr.bf16.mxu1 %v403_v32 }
 0x165   :  { %v342_v22 = vadd.f32 %v341_v19, %v1429_v39  ;;  %v343_v14 = vpop.f32.mrb[30].mxu0 }
 0x166   :  { %v344_v23 = vadd.f32 %v343_v14, %v1427_v38  ;;  %v345_v24 = vpop.f32.mrb[31].mxu0  ;;  %v376_v26 = vmax.f32 %v340_v17, 0.0  ;;  %v1493_v38 = vld [vmem:[%s1546_s4] ss:$0 sm:$0xff]  ;;  %s1310_s4 = smov [#allocation8]  }
 0x167   :  { %v346_v25 = vadd.f32 %v345_v24, %v1429_v39  ;;  %v377_v15 = vmax.f32 %v342_v22, 0.0  ;;  %s858_s8 = sshll.u32 %s1310_s4, 4  ;;  %s859_s8 = int_to_ptr.vmem [resolvable:$true] %s858_s8 }
 0x168   :  { %v378_v27 = vmax.f32 %v344_v23, 0.0  ;;  %s1274_s9 = scalar_lea.vmem %s859_s8, 2048  ;;  %p1279_p11 = scmp.lt.s32.totalorder %s859_s8, %s859_s8 }
 0x169   :  { %v379_v28 = vmax.f32 %v346_v25, 0.0  ;;  %p1275_p10 = scmp.ne.s32.totalorder %s859_s8, %s1274_s9  ;;  %p1280_p12 = scmp.lt.s32.totalorder %s1274_s9, %s1274_s9 }
 0x16a   :  { %v404_v33 = vpack.c.bf16 %v378_v27, %v376_v26 }
 0x16b   :  { %v579_v34 = vpack.c.bf16 %v379_v28, %v377_v15  ;;  %p1281_p13 = por %p1280_p12, %p1279_p11 }
 0x16c   :  { %1124 = vmatmul.mubr.bf16.gmra.mrb[12].mxu1 %v404_v33 }
 0x16d   :  { %1143 = vmatprep.mubr.bf16.mxu1 %v1435_v53  ;;  %p1282_p0 = pnand %p1281_p13, %p1275_p10 }
 0x174   :  { %1144 = vmatmul.mubr.bf16.vlgmr.msra.gmra.mrb[16].mxu1 %v1441_v3 }
 0x175   :  { %1147 = vmatprep.mubr.bf16.mxu1 %v1451_v21 }
 0x17c   :  { %1148 = vmatmul.mubr.bf16.gmra.mrb[20].mxu1 %v1461_v37 }
 0x17d   :  { %1151 = vmatprep.mubr.bf16.mxu1 %v576_v51 }
 0x184   :  { %1152 = vmatmul.mubr.bf16.gmra.mrb[24].mxu1 %v577_v0 }
 0x185   :  { %1155 = vmatprep.mubr.bf16.mxu1 %v578_v13 }
 0x18c   :  { %1156 = vmatmul.mubr.bf16.gmra.mrb[28].mxu1 %v579_v34 }
 0x20f   :  { %v1113_v39 = vpop.f32.mrb[0].mxu1 }
 0x210   :  { %v502_v35 = vadd.f32 %v1113_v39, %v1493_v38  ;;  %v493_v36 = vpop.f32.mrb[1].mxu1 }
 0x211   :  { %v494_v53 = vadd.f32 %v1493_v38, %v493_v36  ;;  %v1114_v3 = vpop.f32.mrb[2].mxu1 }
 0x212   :  { %v505_v21 = vadd.f32 %v1114_v3, %v1493_v38  ;;  %v496_v40 = vpop.f32.mrb[3].mxu1  ;;  %v558_v18 = vmax.f32 %v502_v35, 0.0 }
 0x213   :  { %v497_v37 = vadd.f32 %v1493_v38, %v496_v40  ;;  %v556_v42 = vmax.f32 %v494_v53, 0.0 }
 0x214   :  { %v559_v41 = vmax.f32 %v505_v21, 0.0 }
 0x215   :  { %v557_v43 = vmax.f32 %v497_v37, 0.0 }
 0x216   :  { %v976_v44 = vpack.c.bf16 %v559_v41, %v558_v18 }
 0x217   :  { %v971_v45 = vpack.c.bf16 %v557_v43, %v556_v42 }
 0x218   :  { %1048 = vst [vmem:[#allocation8 + $0x8] sm:$0xff] %v976_v44  }
 0x219   :  { %972 = vst [vmem:[#allocation8] sm:$0xff] %v971_v45  }
 0x21f   :  { %v1117_v20 = vpop.f32.mrb[4].mxu1 }
 0x220   :  { %v518_v46 = vadd.f32 %v1117_v20, %v1493_v38  ;;  %v509_v47 = vpop.f32.mrb[5].mxu1 }
 0x221   :  { %v510_v48 = vadd.f32 %v1493_v38, %v509_v47  ;;  %v1118_v49 = vpop.f32.mrb[6].mxu1 }
 0x222   :  { %v521_v50 = vadd.f32 %v1118_v49, %v1493_v38  ;;  %v512_v51 = vpop.f32.mrb[7].mxu1  ;;  %v562_v29 = vmax.f32 %v518_v46, 0.0 }
 0x223   :  { %v513_v52 = vadd.f32 %v1493_v38, %v512_v51  ;;  %v560_v55 = vmax.f32 %v510_v48, 0.0 }
 0x224   :  { %v563_v54 = vmax.f32 %v521_v50, 0.0 }
 0x225   :  { %v561_v56 = vmax.f32 %v513_v52, 0.0 }
 0x226   :  { %v986_v57 = vpack.c.bf16 %v563_v54, %v562_v29 }
 0x227   :  { %v981_v58 = vpack.c.bf16 %v561_v56, %v560_v55 }
 0x228   :  { %1050 = vst [vmem:[#allocation8 + $0x18] sm:$0xff] %v986_v57  }
 0x229   :  { %1049 = vst [vmem:[#allocation8 + $0x10] sm:$0xff] %v981_v58  }
 0x22f   :  { %v1121_v30 = vpop.f32.mrb[8].mxu1 }
 0x230   :  { %v534_v59 = vadd.f32 %v1121_v30, %v1493_v38  ;;  %v525_v60 = vpop.f32.mrb[9].mxu1 }
 0x231   :  { %v526_v61 = vadd.f32 %v1493_v38, %v525_v60  ;;  %v1122_v62 = vpop.f32.mrb[10].mxu1 }
 0x232   :  { %v537_v63 = vadd.f32 %v1122_v62, %v1493_v38  ;;  %v528_v0 = vpop.f32.mrb[11].mxu1  ;;  %v566_v2 = vmax.f32 %v534_v59, 0.0 }
 0x233   :  { %v529_v1 = vadd.f32 %v1493_v38, %v528_v0  ;;  %v564_v31 = vmax.f32 %v526_v61, 0.0 }
 0x234   :  { %v567_v4 = vmax.f32 %v537_v63, 0.0 }
 0x235   :  { %v565_v5 = vmax.f32 %v529_v1, 0.0 }
 0x236   :  { %v996_v6 = vpack.c.bf16 %v567_v4, %v566_v2 }
 0x237   :  { %v991_v7 = vpack.c.bf16 %v565_v5, %v564_v31 }
 0x238   :  { %1052 = vst [vmem:[#allocation8 + $0x28] sm:$0xff] %v996_v6  }
 0x239   :  { %1051 = vst [vmem:[#allocation8 + $0x20] sm:$0xff] %v991_v7  }
 0x23f   :  { %v1125_v8 = vpop.f32.mrb[12].mxu1 }
 0x240   :  { %v550_v9 = vadd.f32 %v1125_v8, %v1493_v38  ;;  %v541_v10 = vpop.f32.mrb[13].mxu1 }
 0x241   :  { %v542_v11 = vadd.f32 %v1493_v38, %v541_v10  ;;  %v1126_v12 = vpop.f32.mrb[14].mxu1 }
 0x242   :  { %v553_v32 = vadd.f32 %v1126_v12, %v1493_v38  ;;  %v544_v13 = vpop.f32.mrb[15].mxu1  ;;  %v570_v17 = vmax.f32 %v550_v9, 0.0 }
 0x243   :  { %v545_v16 = vadd.f32 %v1493_v38, %v544_v13  ;;  %v568_v22 = vmax.f32 %v542_v11, 0.0 }
 0x244   :  { %v571_v19 = vmax.f32 %v553_v32, 0.0 }
 0x245   :  { %v569_v14 = vmax.f32 %v545_v16, 0.0 }
 0x246   :  { %v1006_v23 = vpack.c.bf16 %v571_v19, %v570_v17 }
 0x247   :  { %v1001_v24 = vpack.c.bf16 %v569_v14, %v568_v22  ;;  %v1145_v25 = vpop.f32.mrb[16].mxu1 }
 0x248   :  { %1054 = vst [vmem:[#allocation8 + $0x38] sm:$0xff] %v1006_v23   ;;  %v623_v26 = vadd.f32 %v1145_v25, %v1493_v38  ;;  %v614_v27 = vpop.f32.mrb[17].mxu1 }
 0x249   :  { %1053 = vst [vmem:[#allocation8 + $0x30] sm:$0xff] %v1001_v24   ;;  %v615_v15 = vadd.f32 %v1493_v38, %v614_v27  ;;  %v1146_v28 = vpop.f32.mrb[18].mxu1 }
 0x24a   :  { %v626_v33 = vadd.f32 %v1146_v28, %v1493_v38  ;;  %v617_v34 = vpop.f32.mrb[19].mxu1  ;;  %v679_v35 = vmax.f32 %v623_v26, 0.0 }
 0x24b   :  { %v618_v39 = vadd.f32 %v1493_v38, %v617_v34  ;;  %v677_v53 = vmax.f32 %v615_v15, 0.0 }
 0x24c   :  { %v680_v36 = vmax.f32 %v626_v33, 0.0 }
 0x24d   :  { %v678_v3 = vmax.f32 %v618_v39, 0.0 }
 0x24e   :  { %v1016_v21 = vpack.c.bf16 %v680_v36, %v679_v35 }
 0x24f   :  { %v1011_v40 = vpack.c.bf16 %v678_v3, %v677_v53  ;;  %v1149_v37 = vpop.f32.mrb[20].mxu1 }
 0x250   :  { %1056 = vst [vmem:[#allocation8 + $0x48] sm:$0xff] %v1016_v21   ;;  %v639_v18 = vadd.f32 %v1149_v37, %v1493_v38  ;;  %v630_v41 = vpop.f32.mrb[21].mxu1 }
 0x251   :  { %1055 = vst [vmem:[#allocation8 + $0x40] sm:$0xff] %v1011_v40   ;;  %v631_v42 = vadd.f32 %v1493_v38, %v630_v41  ;;  %v1150_v43 = vpop.f32.mrb[22].mxu1 }
 0x252   :  { %v642_v44 = vadd.f32 %v1150_v43, %v1493_v38  ;;  %v633_v45 = vpop.f32.mrb[23].mxu1  ;;  %v683_v46 = vmax.f32 %v639_v18, 0.0 }
 0x253   :  { %v634_v20 = vadd.f32 %v1493_v38, %v633_v45  ;;  %v681_v48 = vmax.f32 %v631_v42, 0.0 }
 0x254   :  { %v684_v47 = vmax.f32 %v642_v44, 0.0 }
 0x255   :  { %v682_v49 = vmax.f32 %v634_v20, 0.0 }
 0x256   :  { %v1026_v50 = vpack.c.bf16 %v684_v47, %v683_v46 }
 0x257   :  { %v1021_v51 = vpack.c.bf16 %v682_v49, %v681_v48  ;;  %v1153_v52 = vpop.f32.mrb[24].mxu1 }
 0x258   :  { %1058 = vst [vmem:[#allocation8 + $0x58] sm:$0xff] %v1026_v50   ;;  %v655_v29 = vadd.f32 %v1153_v52, %v1493_v38  ;;  %v646_v54 = vpop.f32.mrb[25].mxu1 }
 0x259   :  { %1057 = vst [vmem:[#allocation8 + $0x50] sm:$0xff] %v1021_v51   ;;  %v647_v55 = vadd.f32 %v1493_v38, %v646_v54  ;;  %v1154_v56 = vpop.f32.mrb[26].mxu1 }
 0x25a   :  { %v658_v57 = vadd.f32 %v1154_v56, %v1493_v38  ;;  %v649_v58 = vpop.f32.mrb[27].mxu1  ;;  %v687_v59 = vmax.f32 %v655_v29, 0.0 }
 0x25b   :  { %v650_v30 = vadd.f32 %v1493_v38, %v649_v58  ;;  %v685_v61 = vmax.f32 %v647_v55, 0.0 }
 0x25c   :  { %v688_v60 = vmax.f32 %v658_v57, 0.0 }
 0x25d   :  { %v686_v62 = vmax.f32 %v650_v30, 0.0 }
 0x25e   :  { %v1036_v63 = vpack.c.bf16 %v688_v60, %v687_v59 }
 0x25f   :  { %v1031_v0 = vpack.c.bf16 %v686_v62, %v685_v61  ;;  %v1157_v1 = vpop.f32.mrb[28].mxu1 }
 0x260   :  { %1060 = vst [vmem:[#allocation8 + $0x68] sm:$0xff] %v1036_v63   ;;  %v671_v2 = vadd.f32 %v1157_v1, %v1493_v38  ;;  %v662_v4 = vpop.f32.mrb[29].mxu1 }
 0x261   :  { %1059 = vst [vmem:[#allocation8 + $0x60] sm:$0xff] %v1031_v0   ;;  %v663_v31 = vadd.f32 %v1493_v38, %v662_v4  ;;  %v1158_v5 = vpop.f32.mrb[30].mxu1 }
 0x262   :  { %v674_v6 = vadd.f32 %v1158_v5, %v1493_v38  ;;  %v665_v7 = vpop.f32.mrb[31].mxu1  ;;  %v691_v9 = vmax.f32 %v671_v2, 0.0 }
 0x263   :  { %v666_v8 = vadd.f32 %v1493_v38, %v665_v7  ;;  %v689_v11 = vmax.f32 %v663_v31, 0.0 }
 0x264   :  { %v692_v10 = vmax.f32 %v674_v6, 0.0 }
 0x265   :  { %v690_v12 = vmax.f32 %v666_v8, 0.0 }
 0x266   :  { %v1046_v32 = vpack.c.bf16 %v692_v10, %v691_v9 }
 0x267   :  { %v1041_v13 = vpack.c.bf16 %v690_v12, %v689_v11 }
 0x268   :  { %1062 = vst [vmem:[#allocation8 + $0x78] sm:$0xff] %v1046_v32  }
 0x269   :  { %1061 = vst [vmem:[#allocation8 + $0x70] sm:$0xff] %v1041_v13  }
 0x26a   :  { %1285 = shalt.err (!%p1282_p0)
}
 0x26b   :  { %s1286_s12 = scalar_lea.hbm %s1547_s5, 2048 }
 0x26c   :  { %p1287_p1 = scmp.ne.s32.totalorder %s1547_s5, %s1286_s12  ;;  %p1290_p2 = scmp.lt.u32.totalorder %s1286_s12, %s1547_s5 }
 0x26e   :  { %p1292_p3 = pnand %p1290_p2, %p1287_p1 }
 0x270   :  { %1295 = shalt.err (!%p1292_p3)
}
 0x271   :  { %864 = dma.vmem_to_hbm [thread:$0]  %s859_s8, 2048, %s1547_s5, [#allocation4], %s1306_s1, %s1306_s1, %s1307_s17  }
 0x272   :  { %1300 = dma.done.wait [#allocation4], 2048  }
 0x273   :  { %1301 = vsyncadd [#allocation4], 4294965248 }
 0x274   :  { %868 = vsyncpa [#allocation3], 1 }
 0x275   :  { %869 = vsyncpa [#allocation6], 1 }
 0x276   :  { %870 = vsyncpa [#allocation4], 1 }

</bundles_post_ra>
